<compile_context>
chip_gen: v6e
topology: v6e:2x2x1
jax: 0.10.0
libtpu: 0.0.40
codegen_flags: <defaults>
</compile_context>

<pallas_src>
import jax
import jax.numpy as jnp
from jax.experimental import pallas as pl
from jax.experimental.pallas import tpu as pltpu


def _round_up(n, m):
    return ((n + m - 1) // m) * m


# ~8 MiB/step working set at f32 (x + out double-buffered, plus the (H, TB)
# hidden intermediate) -> fits v5e's 16 MiB scoped-VMEM default with headroom.
_MAX_TILE_COLS = 65536


def _choose_tiling(B, tile_b):
    """Pick a lane-dense (multiple-of-128) batch tile.

    Targets: big enough to amortize the ~0.35 us/step pipeline overhead,
    >= 2 grid steps when the batch allows it (v7x megacore), and padding
    bounded to < 128 columns per step.
    """
    b128 = _round_up(B, 128)
    if tile_b is None:
        tb = min(_MAX_TILE_COLS, b128)
    else:
        tb = max(128, min(_round_up(tile_b, 128), b128, _MAX_TILE_COLS))
    n_steps = max(-(-b128 // tb), 2 if b128 >= 256 else 1)
    tb = _round_up(-(-b128 // n_steps), 128)
    b_pad = tb * n_steps
    return tb, b_pad, n_steps


def _qnet_kernel(x_ref, w1_ref, b1_ref, w2_ref, b2_ref, out_ref):
    # x_ref  : (S, TB)   batch on the lane axis -> lane-dense load
    # w1_ref : (H, S)    resident across grid steps (constant index_map)
    # b1_ref : (H, 1)
    # w2_ref : (A, H)
    # b2_ref : (A, 1)
    # out_ref: (A, TB)   lane-dense store
    x = x_ref[...]
    h = jnp.dot(w1_ref[...], x, preferred_element_type=jnp.float32) + b1_ref[...]
    h = jnp.maximum(h, 0.0)                                           # ReLU
    y = jnp.dot(w2_ref[...], h, preferred_element_type=jnp.float32) + b2_ref[...]
    out_ref[...] = y.astype(out_ref.dtype)


def q_network1_forward(x, w1, b1, w2, b2, *, tile_b=None, force_pallas=False,
                       x_transposed=False, return_transposed=False):
    """relu(x @ w1.T + b1) @ w2.T + b2 with PyTorch-layout parameters.

    x_transposed=True      : x is already (state_dim, batch) -> no input transpose.
    return_transposed=True : return (action_dim, batch) -> no output transpose
                             (a DQN argmax over actions can use axis=0 directly).
    """
    if x_transposed:
        S, B = x.shape
    else:
        B, S = x.shape
    H = w1.shape[0]
    A = w2.shape[0]

    if not force_pallas and B < 128:
        # Tiny batch: kernel launch + DMA setup dominate; let XLA fuse it.
        y = jnp.maximum((x.T if x_transposed else x) @ w1.T + b1, 0.0) @ w2.T + b2
        return y.T if return_transposed else y

    tb, b_pad, _ = _choose_tiling(B, tile_b)

    # (feature, batch) layout, padded to b_pad columns.
    xt = x if x_transposed else x.T                       # (S, B)
    xt = jnp.pad(xt, ((0, 0), (0, b_pad - B)))            # (S, b_pad)

    dt = x.dtype
    w1c = w1.astype(dt)
    b1c = b1.astype(dt).reshape(H, 1)
    w2c = w2.astype(dt)
    b2c = b2.astype(dt).reshape(A, 1)

    bytes_accessed = 4 * ((S + A) * b_pad + H * S + H + A * H + A)
    flops = 2 * b_pad * (S * H + H * A)

    out_t = pl.pallas_call(
        _qnet_kernel,
        out_shape=jax.ShapeDtypeStruct((A, b_pad), dt),
        grid=(b_pad // tb,),
        in_specs=[
            pl.BlockSpec((S, tb), lambda i: (0, i)),      # x tiles stream
            pl.BlockSpec((H, S), lambda i: (0, 0)),       # params stay resident
            pl.BlockSpec((H, 1), lambda i: (0, 0)),
            pl.BlockSpec((A, H), lambda i: (0, 0)),
            pl.BlockSpec((A, 1), lambda i: (0, 0)),
        ],
        out_specs=pl.BlockSpec((A, tb), lambda i: (0, i)),
        compiler_params=pltpu.CompilerParams(
            dimension_semantics=("parallel",),            # megacore on v7x
        ),
        cost_estimate=pl.CostEstimate(
            flops=flops, transcendentals=0, bytes_accessed=bytes_accessed),
    )(xt, w1c, b1c, w2c, b2c)

    out_t = out_t[:, :B]                                  # (A, B)
    return out_t if return_transposed else out_t.T        # (B, A) by default


def init_params(key, state_dim, action_dim, hidden=16):
    """Deterministic init mimicking PyTorch nn.Linear (uniform +-1/sqrt(fan_in))."""
    k1, k2, k3, k4 = jax.random.split(key, 4)
    lim1 = 1.0 / jnp.sqrt(state_dim)
    lim2 = 1.0 / jnp.sqrt(hidden)
    w1 = jax.random.uniform(k1, (hidden, state_dim), jnp.float32, -lim1, lim1)
    b1 = jax.random.uniform(k2, (hidden,), jnp.float32, -lim1, lim1)
    w2 = jax.random.uniform(k3, (action_dim, hidden), jnp.float32, -lim2, lim2)
    b2 = jax.random.uniform(k4, (action_dim,), jnp.float32, -lim2, lim2)
    return w1, b1, w2, b2


if __name__ == "__main__":
    key = jax.random.PRNGKey(0)
    kx, kx2, kp = jax.random.split(key, 3)

    state_dim, action_dim = 4, 2
    w1, b1, w2, b2 = init_params(kp, state_dim, action_dim)

    def ref(x):
        return jnp.maximum(x @ w1.T + b1, 0.0) @ w2.T + b2

    # Small batch (typical DQN inference) -- force the Pallas path so the
    # kernel itself is exercised (single 128-wide grid step after padding).
    x_small = jax.random.normal(kx, (8, state_dim), dtype=jnp.float32)
    out_small = q_network1_forward(x_small, w1, b1, w2, b2, force_pallas=True)
    jax.block_until_ready(out_small)
    assert out_small.shape == (8, action_dim)
    assert jnp.allclose(out_small, ref(x_small), atol=1e-5, rtol=1e-5)

    # Larger batch -- exercises >=2 pipelined grid steps (megacore-shardable)
    # with resident params and adaptive lane-dense tiling.
    x_big = jax.random.normal(kx2, (1024, state_dim), dtype=jnp.float32)
    out_big = q_network1_forward(x_big, w1, b1, w2, b2)
    jax.block_until_ready(out_big)
    assert out_big.shape == (1024, action_dim)
    assert jnp.allclose(out_big, ref(x_big), atol=1e-5, rtol=1e-5)

    # Transposed-IO path: (feature, batch) in, (action, batch) out -- no
    # wrapper transposes touch HBM.
    out_tb = q_network1_forward(x_big.T, w1, b1, w2, b2,
                                x_transposed=True, return_transposed=True)
    jax.block_until_ready(out_tb)
    assert out_tb.shape == (action_dim, 1024)
    assert jnp.allclose(out_tb, ref(x_big).T, atol=1e-5, rtol=1e-5)

    print("KERNEL_OK")
</pallas_src>

<mosaic_0001>
module attributes {stable_mosaic.version = 11 : i64} {
  func.func @_qnet_kernel(%arg0: i32, %arg1: memref<4x128xf32, #tpu.memory_space<vmem>>, %arg2: memref<16x4xf32, #tpu.memory_space<vmem>>, %arg3: memref<16x1xf32, #tpu.memory_space<vmem>>, %arg4: memref<2x16xf32, #tpu.memory_space<vmem>>, %arg5: memref<2x1xf32, #tpu.memory_space<vmem>>, %arg6: memref<2x128xf32, #tpu.memory_space<vmem>>) attributes {dimension_semantics = [#tpu.dimension_semantics<parallel>], iteration_bounds = array<i64: 1>, scalar_prefetch = 0 : i64, scratch_operands = 0 : i64, tpu.core_type = #tpu.core_type<tc>, window_params = [{transform_indices = @transform_0, window_bounds = array<i64: 4, 128>}, {pipeline_mode = #tpu.pipeline_mode<synchronous>, transform_indices = @transform_1, window_bounds = array<i64: 16, 4>}, {pipeline_mode = #tpu.pipeline_mode<synchronous>, transform_indices = @transform_2, window_bounds = array<i64: 16, 1>}, {pipeline_mode = #tpu.pipeline_mode<synchronous>, transform_indices = @transform_3, window_bounds = array<i64: 2, 16>}, {pipeline_mode = #tpu.pipeline_mode<synchronous>, transform_indices = @transform_4, window_bounds = array<i64: 2, 1>}, {transform_indices = @transform_5, window_bounds = array<i64: 2, 128>}]} {
    %c0 = arith.constant 0 : index
    %c0_0 = arith.constant 0 : index
    %0 = vector.load %arg1[%c0, %c0_0] : memref<4x128xf32, #tpu.memory_space<vmem>>, vector<4x128xf32>
    %c0_1 = arith.constant 0 : index
    %c0_2 = arith.constant 0 : index
    %1 = vector.load %arg2[%c0_1, %c0_2] : memref<16x4xf32, #tpu.memory_space<vmem>>, vector<16x4xf32>
    %cst = arith.constant dense<0.000000e+00> : vector<16x128xf32>
    %2 = tpu.matmul %1, %0, %cst {dimension_numbers = #tpu.dot_dimension_numbers<[1], [0], [0], [1], [0, 0, 1, 1], [], []>} : vector<16x4xf32>, vector<4x128xf32>, vector<16x128xf32> -> vector<16x128xf32>
    %c0_3 = arith.constant 0 : index
    %c0_4 = arith.constant 0 : index
    %3 = vector.load %arg3[%c0_3, %c0_4] : memref<16x1xf32, #tpu.memory_space<vmem>>, vector<16x1xf32>
    %4 = vector.broadcast %3 : vector<16x1xf32> to vector<16x128xf32>
    %5 = arith.addf %2, %4 : vector<16x128xf32>
    %cst_5 = arith.constant 0.000000e+00 : f32
    %6 = vector.broadcast %cst_5 : f32 to vector<16x128xf32>
    %7 = arith.maximumf %5, %6 : vector<16x128xf32>
    %c0_6 = arith.constant 0 : index
    %c0_7 = arith.constant 0 : index
    %8 = vector.load %arg4[%c0_6, %c0_7] : memref<2x16xf32, #tpu.memory_space<vmem>>, vector<2x16xf32>
    %cst_8 = arith.constant dense<0.000000e+00> : vector<2x128xf32>
    %9 = tpu.matmul %8, %7, %cst_8 {dimension_numbers = #tpu.dot_dimension_numbers<[1], [0], [0], [1], [0, 0, 1, 1], [], []>} : vector<2x16xf32>, vector<16x128xf32>, vector<2x128xf32> -> vector<2x128xf32>
    %c0_9 = arith.constant 0 : index
    %c0_10 = arith.constant 0 : index
    %10 = vector.load %arg5[%c0_9, %c0_10] : memref<2x1xf32, #tpu.memory_space<vmem>>, vector<2x1xf32>
    %11 = vector.broadcast %10 : vector<2x1xf32> to vector<2x128xf32>
    %12 = arith.addf %9, %11 : vector<2x128xf32>
    %c0_11 = arith.constant 0 : index
    %c0_12 = arith.constant 0 : index
    %13 = vector.load %arg6[%c0_11, %c0_12] : memref<2x128xf32, #tpu.memory_space<vmem>>, vector<2x128xf32>
    tpu.vector_store %arg6[%c0_11, %c0_12], %12 {strides = array<i32>} : memref<2x128xf32, #tpu.memory_space<vmem>>, vector<2x128xf32>,
    return
  }
  func.func @transform_0(%arg0: i32) -> (i32, i32) {
    %c0_i32 = arith.constant 0 : i32
    %c0_i32_0 = arith.constant 0 : i32
    return %c0_i32, %arg0 : i32, i32
  }
  func.func @transform_1(%arg0: i32) -> (i32, i32) {
    %c0_i32 = arith.constant 0 : i32
    %c0_i32_0 = arith.constant 0 : i32
    %c0_i32_1 = arith.constant 0 : i32
    return %c0_i32, %c0_i32_0 : i32, i32
  }
  func.func @transform_2(%arg0: i32) -> (i32, i32) {
    %c0_i32 = arith.constant 0 : i32
    %c0_i32_0 = arith.constant 0 : i32
    %c0_i32_1 = arith.constant 0 : i32
    return %c0_i32, %c0_i32_0 : i32, i32
  }
  func.func @transform_3(%arg0: i32) -> (i32, i32) {
    %c0_i32 = arith.constant 0 : i32
    %c0_i32_0 = arith.constant 0 : i32
    %c0_i32_1 = arith.constant 0 : i32
    return %c0_i32, %c0_i32_0 : i32, i32
  }
  func.func @transform_4(%arg0: i32) -> (i32, i32) {
    %c0_i32 = arith.constant 0 : i32
    %c0_i32_0 = arith.constant 0 : i32
    %c0_i32_1 = arith.constant 0 : i32
    return %c0_i32, %c0_i32_0 : i32, i32
  }
  func.func @transform_5(%arg0: i32) -> (i32, i32) {
    %c0_i32 = arith.constant 0 : i32
    %c0_i32_0 = arith.constant 0 : i32
    return %c0_i32, %arg0 : i32, i32
  }
}

</mosaic_0001>

<bundles_post_ra>
// kernel: tpu_custom_call.1
= control target key start
LH: loop header
LB: loop body
LE: loop exit
PB: predicated region body
PF: predicated region fallthrough
CT: control target
= control target key end

     0   :  { %vm43_vm0 = vcmask 1043456   ;;  %vm36_vm1 = vcmask 31744   ;;  %s328_s0 = inlined_call_operand.vmem [shape: f32[4,128], index: 0, kind: input, shape index: {}]   ;;  %s329_s1 = inlined_call_operand.vmem [shape: f32[16,4], index: 1, kind: input, shape index: {}]   ;;  %s330_s2 = inlined_call_operand.vmem [shape: f32[16,1], index: 2, kind: input, shape index: {}]   ;;  %s331_s3 = inlined_call_operand.vmem [shape: f32[2,16], index: 3, kind: input, shape index: {}]   ;;  %s332_s4 = inlined_call_operand.vmem [shape: f32[2,1], index: 4, kind: input, shape index: {}]   ;;  %s333_s5 = inlined_call_operand.hbm [shape: f32[2,128], index: 5, kind: output, shape index: {}]  }
   0x1   :  { %v21_v0 = vld [vmem:[%s328_s0] sm:$0xf]  ;;  %v23_v2 = vld [vmem:[%s329_s1 + $0x8] sm:$0xff] }
   0x2   :  { %v22_v1 = vld [vmem:[%s329_s1] sm:$0xff]  ;;  %230 = vmatprep.subr.msk.mxu0 %vm43_vm0, %v21_v0  ;;  %v25_v3 = vld [vmem:[%s330_s2 + $0x8] sm:$0xff] }
   0x3   :  { %232 = vmatprep.mubr.msk.f32.mxu0 %vm36_vm1, %v22_v1 }
   0x4   :  { %10 = vsyncpa [#allocation3], 0  ;;  %231 = vmatpush3.msk.msra.mxu0 %vm43_vm0, %v21_v0  ;;  %v270_v4 = vmov 0   ;;  %v24_v5 = vld [vmem:[%s330_s2] sm:$0xff]  ;;  %v271_v6 = vmov 0.0   ;;  %vm272_vm2 = vmmov 0  }
   0x5   :  { %246 = vset.pattern.permute.xlu0 %v270_v4  ;;  %233 = vmatmul.mubr.msk.f32.vlgmr.msra.gmra.mxu0 %vm36_vm1, %v23_v2  ;;  %v125_v7 = vld [vmem:[%s332_s4] sm:$0x3]  ;;  %vm131_vm3 = vcmask 130048   ;;  %s273_s4 = smov [#allocation2]  }
   0x6   :  { %33 = vperm.xlu0 %246, %v25_v3   ;;  %247 = vset.pattern.permute.xlu1 %v270_v4  ;;  %v124_v16 = vld [vmem:[%s331_s3] sm:$0x3]  ;;  %s212_s29 = sshll.u32 %s273_s4, 4  ;;  %s213_s29 = int_to_ptr.vmem [resolvable:$true] %s212_s29 }
   0x7   :  { %235 = vmatprep.subr.mxu1 %v271_v6  ;;  %239 = vmatprep.mubr.msk.f32.mxu1 %vm272_vm2, %v271_v6  ;;  %s248_s30 = scalar_lea.vmem %s213_s29, 32  ;;  %p253_p1 = scmp.lt.s32.totalorder %s213_s29, %s213_s29 }
   0x8   :  { %128 = vperm.xlu1 %247, %v125_v7   ;;  %p249_p0 = scmp.ne.s32.totalorder %s213_s29, %s248_s30  ;;  %p254_p2 = scmp.lt.s32.totalorder %s248_s30, %s248_s30 }
   0xa   :  { %28 = vperm.xlu0 %246, %v24_v5   ;;  %p255_p3 = por %p254_p2, %p253_p1 }
   0xc   :  { %p256_p4 = pnand %p255_p3, %p249_p0 }
  0x81   :  { %v34_v8 = vpop.permute.xlu0 %33 }
  0x83   :  { %v129_v17 = vpop.permute.xlu1 %128 }
  0x85   :  { %v29_v11 = vpop.permute.xlu0 %28 }
  0xc5   :  { %v234_v9 = vpop.f32.mrf.mxu0 }
  0xc6   :  { %v119_v10 = vadd.f32 %v234_v9, %v34_v8 }
  0xc7   :  { %v113_v12 = vpop.f32.mrf.mxu0 }
  0xc8   :  { %v123_v13 = vmax.f32 %v119_v10, 0.0  ;;  %v114_v14 = vadd.f32 %v113_v12, %v29_v11 }
  0xca   :  { %v122_v15 = vmax.f32 %v114_v14, 0.0  ;;  %236 = vmatpush3.msra.mxu1 %v123_v13 }
  0xcb   :  { %237 = vmatprep.subr.mxu1 %v271_v6 }
  0xcc   :  { %238 = vmatpush3.msra.mxu1 %v122_v15 }
  0xcd   :  { %240 = vmatmul.mubr.msk.f32.vlgmr.msra.gmra.mxu1 %vm131_vm3, %v124_v16 }
 0x18d   :  { %v201_v18 = vpop.f32.mrf.mxu1 }
 0x18e   :  { %v202_v19 = vadd.f32 %v201_v18, %v129_v17 }
 0x18f   :  { %v241_v20 = vpop.f32.mrf.mxu1 }
 0x190   :  { %205 = vst [vmem:[#allocation2] sm:$0x3] %v202_v19 }
 0x191   :  { %259 = shalt.err (!%p256_p4)
}
 0x192   :  { %215 = dma.vmem_to_hbm [thread:$0]  %s213_s29, 32, %s333_s5, [#allocation3]  }
 0x193   :  { %268 = dma.done.wait [#allocation3], 32  }
 0x194   :  { %269 = vsyncadd [#allocation3], 4294967264 }
 0x195   :  { %219 = vsyncpa [#allocation3], 1 }

</bundles_post_ra>
